<compile_context>
chip_gen: v7x
topology: tpu7x:2x2x1
jax: 0.10.0
libtpu: 0.0.40
codegen_flags: <defaults>
</compile_context>

<pallas_src>
import functools

import jax
import jax.numpy as jnp
from jax.experimental import pallas as pl
from jax.experimental.pallas import tpu as pltpu


def _round_up(a, m):
    return -(-a // m) * m


def _stackcnn_kernel(layer_num, K, pad, mxu_dtype, *refs):
    """refs = (x_ref, w_0..w_{L-1}, b_0..b_{L-1}, out_ref).

    x_ref:   (NB, L_out0, KC0_pad)  mxu_dtype, first-layer im2col built in the wrapper
    w_0:     (KC0_pad, C_pad)       mxu_dtype
    w_i>=1:  (K, C_pad, C_pad)      mxu_dtype (per-tap weight slabs)
    b_i:     (1, C_pad)             f32
    out_ref: (NB, C_pad)            f32
    """
    x_ref = refs[0]
    w_refs = refs[1:1 + layer_num]
    b_refs = refs[1 + layer_num:1 + 2 * layer_num]
    out_ref = refs[1 + 2 * layer_num]

    NB, L0, KC0 = x_ref.shape
    C_pad = w_refs[0].shape[-1]

    # ---- Layer 0: input already im2col'd -> one fused MXU matmul over the block ----
    cols0 = x_ref[...].reshape(NB * L0, KC0)
    acc = jnp.dot(cols0, w_refs[0][...], preferred_element_type=jnp.float32)
    a = jnp.maximum(acc + b_refs[0][...], 0.0).reshape(NB, L0, C_pad)       # f32

    # ---- Layers >= 1: K accumulating per-tap matmuls, no lane-axis concat ----
    for i in range(1, layer_num):
        L_in = a.shape[1]
        L_out = L_in + 2 * pad - K + 1
        ab = a.astype(mxu_dtype)                     # carry matmul inputs in bf16
        if pad > 0:
            z = jnp.zeros((NB, pad, C_pad), mxu_dtype)
            ab = jnp.concatenate([z, ab, z], axis=1)     # (NB, L_in + 2*pad, C_pad)
        acc = None
        for k in range(K):
            tap = ab[:, k:k + L_out, :].reshape(NB * L_out, C_pad)
            part = jnp.dot(tap, w_refs[i][k], preferred_element_type=jnp.float32)
            acc = part if acc is None else acc + part
        a = jnp.maximum(acc + b_refs[i][...], 0.0).reshape(NB, L_out, C_pad)  # f32

    # AdaptiveMaxPool1d(1) + squeeze(-1): max over the length axis, lane-dense store.
    out_ref[...] = jnp.max(a, axis=1)                # (NB, C_pad)


def stackcnn_forward(x, weights, biases, kernel_size, padding, *,
                     mxu_dtype=jnp.bfloat16,
                     vmem_budget_bytes=12 * 1024 * 1024):
    """x: (N, C_in, L) float32; weights[i]: (C_out_i, C_in_i, K); biases[i]: (C_out_i,)."""
    N, C_in, L = x.shape
    K, pad = kernel_size, padding
    layer_num = len(weights)
    C_out = weights[-1].shape[0]

    # Static sanity: stride == 1 and output length stays >= 1 at every layer.
    L_outs, L_cur = [], L
    for _ in range(layer_num):
        L_cur = L_cur + 2 * pad - K + 1
        assert L_cur >= 1, "conv output length would drop below 1"
        L_outs.append(L_cur)
    L0 = L_outs[0]

    C_pad = _round_up(C_out, 128)            # every layer's output channels padded to 128
    KC0 = K * C_in
    KC0_pad = _round_up(KC0, 128)

    # ---- First layer pre-processing in XLA: pad + im2col + lane-pad + bf16 cast ----
    x_nlc = jnp.transpose(x, (0, 2, 1)).astype(jnp.float32)          # (N, L, C_in)
    if pad > 0:
        x_nlc = jnp.pad(x_nlc, ((0, 0), (pad, pad), (0, 0)))
    cols0 = jnp.concatenate([x_nlc[:, k:k + L0, :] for k in range(K)],
                            axis=-1)                                 # (N, L0, K*C_in)
    if KC0_pad > KC0:
        cols0 = jnp.pad(cols0, ((0, 0), (0, 0), (0, KC0_pad - KC0)))
    cols0 = cols0.astype(mxu_dtype)

    # ---- Batch block sized from a VMEM budget (rough but conservative estimate) ----
    L_max = max(L_outs)
    per_sample = (
        L0 * KC0_pad * 2 * 2            # bf16 input block, double-buffered
        + C_pad * 4 * 2                 # f32 output block, double-buffered
        + L_max * C_pad * 4             # f32 activation
        + (L_max + 2 * pad) * C_pad * 2 * 2   # bf16 activation + zero-padded copy
        + L_max * C_pad * 2             # per-tap slice copy
        + L_max * C_pad * 4             # f32 accumulator
    )
    nb_cap = max(8, min(1024, (vmem_budget_bytes // per_sample) // 8 * 8))
    if N <= 8:
        NB = N                                          # single tiny block
    else:
        # Keep >= 2 blocks so v7x's two TensorCores both get work; on single-TC
        # v5e/v6e the extra grid step costs ~0.35 us (negligible).
        NB = min(nb_cap, _round_up(-(-N // 2), 8))
    N_pad = _round_up(N, NB)
    if N_pad > N:
        cols0 = jnp.pad(cols0, ((0, N_pad - N), (0, 0), (0, 0)))

    # ---- Weight / bias prep: channel-padded, bf16, matmul-ready layouts ----
    w_args, b_args = [], []
    for i, (w, b) in enumerate(zip(weights, biases)):
        co, ci, k = w.shape
        assert k == K, "all layers must share the same kernel size"
        if i == 0:
            # (C_out, C_in, K) -> (K*C_in, C_out), matching cols0's k*C_in + ci order.
            wt = jnp.transpose(w, (2, 1, 0)).reshape(K * ci, co)
            wt = jnp.pad(wt, ((0, KC0_pad - K * ci), (0, C_pad - co)))
        else:
            # Per-tap slabs: wt[k, ci, co] = w[co, ci, k], channel dims padded to 128.
            wt = jnp.transpose(w, (2, 1, 0))                     # (K, C_in, C_out)
            wt = jnp.pad(wt, ((0, 0), (0, C_pad - ci), (0, C_pad - co)))
        w_args.append(wt.astype(mxu_dtype))
        bt = jnp.pad(b.reshape(1, co), ((0, 0), (0, C_pad - co)))
        b_args.append(bt.astype(jnp.float32))

    kernel = functools.partial(_stackcnn_kernel, layer_num, K, pad, mxu_dtype)

    in_specs = [pl.BlockSpec((NB, L0, KC0_pad), lambda i: (i, 0, 0))]
    for wt in w_args:
        if wt.ndim == 2:
            in_specs.append(pl.BlockSpec(wt.shape, lambda i: (0, 0)))
        else:
            in_specs.append(pl.BlockSpec(wt.shape, lambda i: (0, 0, 0)))
    for bt in b_args:
        in_specs.append(pl.BlockSpec(bt.shape, lambda i: (0, 0)))

    out = pl.pallas_call(
        kernel,
        out_shape=jax.ShapeDtypeStruct((N_pad, C_pad), jnp.float32),
        grid=(N_pad // NB,),
        in_specs=in_specs,
        out_specs=pl.BlockSpec((NB, C_pad), lambda i: (i, 0)),
        compiler_params=pltpu.CompilerParams(
            dimension_semantics=("parallel",),      # shards batch blocks across TCs on v7x
            vmem_limit_bytes=32 * 1024 * 1024,      # safe on v5e/v6e (128 MiB) and v7x (64 MiB)
        ),
    )(cols0, *w_args, *b_args)

    return out[:N, :C_out]


def stackcnn_reference(x, weights, biases, padding):
    """Pure-JAX f32 reference mirroring the PyTorch forward (NCL layout)."""
    cur = x.astype(jnp.float32)
    for w, b in zip(weights, biases):
        C_o, C_i, K = w.shape
        xp = jnp.pad(cur, ((0, 0), (0, 0), (padding, padding)))
        L_out = xp.shape[-1] - K + 1
        cols = jnp.stack([xp[:, :, k:k + L_out] for k in range(K)], axis=-1)  # (N,C_i,L_out,K)
        out = jnp.einsum('nclk,ock->nol', cols, w,
                         precision=jax.lax.Precision.HIGHEST) + b[None, :, None]
        cur = jax.nn.relu(out)
    return jnp.max(cur, axis=-1)  # AdaptiveMaxPool1d(1) + squeeze(-1)


if __name__ == "__main__":
    # StackCNN(layer_num=3, in_channels=4, out_channels=32, kernel_size=3, padding=1)
    layer_num, C_in, C_out, K, pad = 3, 4, 32, 3, 1
    N, L = 2, 16

    key = jax.random.PRNGKey(0)
    key, kx = jax.random.split(key)
    x = jax.random.normal(kx, (N, C_in, L), jnp.float32)

    weights, biases = [], []
    cin = C_in
    for _ in range(layer_num):
        key, k1, k2 = jax.random.split(key, 3)
        bound = 1.0 / (cin * K) ** 0.5
        weights.append(jax.random.uniform(k1, (C_out, cin, K), jnp.float32, -bound, bound))
        biases.append(jax.random.uniform(k2, (C_out,), jnp.float32, -bound, bound))
        cin = C_out

    out = stackcnn_forward(x, weights, biases, K, pad)
    out = jax.block_until_ready(out)

    ref = stackcnn_reference(x, weights, biases, pad)
    assert out.shape == (N, C_out), out.shape
    # bf16 MXU inputs with f32 accumulation; tolerance sized accordingly.
    assert jnp.allclose(out, ref, atol=2e-2, rtol=2e-2), (out, ref)

    print("KERNEL_OK")
</pallas_src>

<mosaic_0001>
module attributes {stable_mosaic.version = 11 : i64} {
  func.func @_stackcnn_kernel(%arg0: i32, %arg1: memref<2x16x128xbf16, #tpu.memory_space<vmem>>, %arg2: memref<128x128xbf16, #tpu.memory_space<vmem>>, %arg3: memref<3x128x128xbf16, #tpu.memory_space<vmem>>, %arg4: memref<3x128x128xbf16, #tpu.memory_space<vmem>>, %arg5: memref<1x128xf32, #tpu.memory_space<vmem>>, %arg6: memref<1x128xf32, #tpu.memory_space<vmem>>, %arg7: memref<1x128xf32, #tpu.memory_space<vmem>>, %arg8: memref<2x128xf32, #tpu.memory_space<vmem>>) attributes {dimension_semantics = [#tpu.dimension_semantics<parallel>], iteration_bounds = array<i64: 1>, scalar_prefetch = 0 : i64, scratch_operands = 0 : i64, tpu.core_type = #tpu.core_type<tc>, window_params = [{transform_indices = @transform_0, window_bounds = array<i64: 2, 16, 128>}, {pipeline_mode = #tpu.pipeline_mode<synchronous>, transform_indices = @transform_1, window_bounds = array<i64: 128, 128>}, {pipeline_mode = #tpu.pipeline_mode<synchronous>, transform_indices = @transform_2, window_bounds = array<i64: 3, 128, 128>}, {pipeline_mode = #tpu.pipeline_mode<synchronous>, transform_indices = @transform_3, window_bounds = array<i64: 3, 128, 128>}, {pipeline_mode = #tpu.pipeline_mode<synchronous>, transform_indices = @transform_4, window_bounds = array<i64: 1, 128>}, {pipeline_mode = #tpu.pipeline_mode<synchronous>, transform_indices = @transform_5, window_bounds = array<i64: 1, 128>}, {pipeline_mode = #tpu.pipeline_mode<synchronous>, transform_indices = @transform_6, window_bounds = array<i64: 1, 128>}, {transform_indices = @transform_7, window_bounds = array<i64: 2, 128>}]} {
    %c0 = arith.constant 0 : index
    %c0_0 = arith.constant 0 : index
    %c0_1 = arith.constant 0 : index
    %0 = vector.load %arg1[%c0, %c0_0, %c0_1] : memref<2x16x128xbf16, #tpu.memory_space<vmem>>, vector<2x16x128xbf16>
    %1 = vector.shape_cast %0 : vector<2x16x128xbf16> to vector<32x128xbf16>
    %c0_2 = arith.constant 0 : index
    %c0_3 = arith.constant 0 : index
    %2 = vector.load %arg2[%c0_2, %c0_3] : memref<128x128xbf16, #tpu.memory_space<vmem>>, vector<128x128xbf16>
    %cst = arith.constant dense<0.000000e+00> : vector<32x128xf32>
    %3 = tpu.matmul %1, %2, %cst {dimension_numbers = #tpu.dot_dimension_numbers<[1], [0], [0], [1], [0, 0, 1, 1], [], []>} : vector<32x128xbf16>, vector<128x128xbf16>, vector<32x128xf32> -> vector<32x128xf32>
    %c0_4 = arith.constant 0 : index
    %c0_5 = arith.constant 0 : index
    %4 = vector.load %arg5[%c0_4, %c0_5] : memref<1x128xf32, #tpu.memory_space<vmem>>, vector<1x128xf32>
    %5 = vector.broadcast %4 : vector<1x128xf32> to vector<32x128xf32>
    %6 = arith.addf %3, %5 : vector<32x128xf32>
    %cst_6 = arith.constant 0.000000e+00 : f32
    %7 = vector.broadcast %cst_6 : f32 to vector<32x128xf32>
    %8 = arith.maximumf %6, %7 : vector<32x128xf32>
    %9 = vector.shape_cast %8 : vector<32x128xf32> to vector<2x16x128xf32>
    %10 = arith.truncf %9 : vector<2x16x128xf32> to vector<2x16x128xbf16>
    %cst_7 = arith.constant 0.000000e+00 : bf16
    %11 = vector.broadcast %cst_7 : bf16 to vector<2x1x128xbf16>
    %12 = tpu.concatenate %11, %10, %11 in 1 : vector<2x1x128xbf16>, vector<2x16x128xbf16>, vector<2x1x128xbf16> -> vector<2x18x128xbf16>
    %13 = vector.extract_strided_slice %12 {offsets = [0, 0, 0], sizes = [2, 16, 128], strides = [1, 1, 1]} : vector<2x18x128xbf16> to vector<2x16x128xbf16>
    %14 = vector.shape_cast %13 : vector<2x16x128xbf16> to vector<32x128xbf16>
    %c0_8 = arith.constant 0 : index
    %c0_9 = arith.constant 0 : index
    %c0_10 = arith.constant 0 : index
    %15 = vector.load %arg3[%c0_8, %c0_9, %c0_10] : memref<3x128x128xbf16, #tpu.memory_space<vmem>>, vector<1x128x128xbf16>
    %16 = vector.shape_cast %15 : vector<1x128x128xbf16> to vector<128x128xbf16>
    %cst_11 = arith.constant dense<0.000000e+00> : vector<32x128xf32>
    %17 = tpu.matmul %14, %16, %cst_11 {dimension_numbers = #tpu.dot_dimension_numbers<[1], [0], [0], [1], [0, 0, 1, 1], [], []>} : vector<32x128xbf16>, vector<128x128xbf16>, vector<32x128xf32> -> vector<32x128xf32>
    %18 = vector.extract_strided_slice %12 {offsets = [0, 1, 0], sizes = [2, 16, 128], strides = [1, 1, 1]} : vector<2x18x128xbf16> to vector<2x16x128xbf16>
    %19 = vector.shape_cast %18 : vector<2x16x128xbf16> to vector<32x128xbf16>
    %c1 = arith.constant 1 : index
    %c0_12 = arith.constant 0 : index
    %c0_13 = arith.constant 0 : index
    %20 = vector.load %arg3[%c1, %c0_12, %c0_13] : memref<3x128x128xbf16, #tpu.memory_space<vmem>>, vector<1x128x128xbf16>
    %21 = vector.shape_cast %20 : vector<1x128x128xbf16> to vector<128x128xbf16>
    %cst_14 = arith.constant dense<0.000000e+00> : vector<32x128xf32>
    %22 = tpu.matmul %19, %21, %cst_14 {dimension_numbers = #tpu.dot_dimension_numbers<[1], [0], [0], [1], [0, 0, 1, 1], [], []>} : vector<32x128xbf16>, vector<128x128xbf16>, vector<32x128xf32> -> vector<32x128xf32>
    %23 = arith.addf %17, %22 : vector<32x128xf32>
    %24 = vector.extract_strided_slice %12 {offsets = [0, 2, 0], sizes = [2, 16, 128], strides = [1, 1, 1]} : vector<2x18x128xbf16> to vector<2x16x128xbf16>
    %25 = vector.shape_cast %24 : vector<2x16x128xbf16> to vector<32x128xbf16>
    %c2 = arith.constant 2 : index
    %c0_15 = arith.constant 0 : index
    %c0_16 = arith.constant 0 : index
    %26 = vector.load %arg3[%c2, %c0_15, %c0_16] : memref<3x128x128xbf16, #tpu.memory_space<vmem>>, vector<1x128x128xbf16>
    %27 = vector.shape_cast %26 : vector<1x128x128xbf16> to vector<128x128xbf16>
    %cst_17 = arith.constant dense<0.000000e+00> : vector<32x128xf32>
    %28 = tpu.matmul %25, %27, %cst_17 {dimension_numbers = #tpu.dot_dimension_numbers<[1], [0], [0], [1], [0, 0, 1, 1], [], []>} : vector<32x128xbf16>, vector<128x128xbf16>, vector<32x128xf32> -> vector<32x128xf32>
    %29 = arith.addf %23, %28 : vector<32x128xf32>
    %c0_18 = arith.constant 0 : index
    %c0_19 = arith.constant 0 : index
    %30 = vector.load %arg6[%c0_18, %c0_19] : memref<1x128xf32, #tpu.memory_space<vmem>>, vector<1x128xf32>
    %31 = vector.broadcast %30 : vector<1x128xf32> to vector<32x128xf32>
    %32 = arith.addf %29, %31 : vector<32x128xf32>
    %cst_20 = arith.constant 0.000000e+00 : f32
    %33 = vector.broadcast %cst_20 : f32 to vector<32x128xf32>
    %34 = arith.maximumf %32, %33 : vector<32x128xf32>
    %35 = vector.shape_cast %34 : vector<32x128xf32> to vector<2x16x128xf32>
    %36 = arith.truncf %35 : vector<2x16x128xf32> to vector<2x16x128xbf16>
    %cst_21 = arith.constant 0.000000e+00 : bf16
    %37 = vector.broadcast %cst_21 : bf16 to vector<2x1x128xbf16>
    %38 = tpu.concatenate %37, %36, %37 in 1 : vector<2x1x128xbf16>, vector<2x16x128xbf16>, vector<2x1x128xbf16> -> vector<2x18x128xbf16>
    %39 = vector.extract_strided_slice %38 {offsets = [0, 0, 0], sizes = [2, 16, 128], strides = [1, 1, 1]} : vector<2x18x128xbf16> to vector<2x16x128xbf16>
    %40 = vector.shape_cast %39 : vector<2x16x128xbf16> to vector<32x128xbf16>
    %c0_22 = arith.constant 0 : index
    %c0_23 = arith.constant 0 : index
    %c0_24 = arith.constant 0 : index
    %41 = vector.load %arg4[%c0_22, %c0_23, %c0_24] : memref<3x128x128xbf16, #tpu.memory_space<vmem>>, vector<1x128x128xbf16>
    %42 = vector.shape_cast %41 : vector<1x128x128xbf16> to vector<128x128xbf16>
    %cst_25 = arith.constant dense<0.000000e+00> : vector<32x128xf32>
    %43 = tpu.matmul %40, %42, %cst_25 {dimension_numbers = #tpu.dot_dimension_numbers<[1], [0], [0], [1], [0, 0, 1, 1], [], []>} : vector<32x128xbf16>, vector<128x128xbf16>, vector<32x128xf32> -> vector<32x128xf32>
    %44 = vector.extract_strided_slice %38 {offsets = [0, 1, 0], sizes = [2, 16, 128], strides = [1, 1, 1]} : vector<2x18x128xbf16> to vector<2x16x128xbf16>
    %45 = vector.shape_cast %44 : vector<2x16x128xbf16> to vector<32x128xbf16>
    %c1_26 = arith.constant 1 : index
    %c0_27 = arith.constant 0 : index
    %c0_28 = arith.constant 0 : index
    %46 = vector.load %arg4[%c1_26, %c0_27, %c0_28] : memref<3x128x128xbf16, #tpu.memory_space<vmem>>, vector<1x128x128xbf16>
    %47 = vector.shape_cast %46 : vector<1x128x128xbf16> to vector<128x128xbf16>
    %cst_29 = arith.constant dense<0.000000e+00> : vector<32x128xf32>
    %48 = tpu.matmul %45, %47, %cst_29 {dimension_numbers = #tpu.dot_dimension_numbers<[1], [0], [0], [1], [0, 0, 1, 1], [], []>} : vector<32x128xbf16>, vector<128x128xbf16>, vector<32x128xf32> -> vector<32x128xf32>
    %49 = arith.addf %43, %48 : vector<32x128xf32>
    %50 = vector.extract_strided_slice %38 {offsets = [0, 2, 0], sizes = [2, 16, 128], strides = [1, 1, 1]} : vector<2x18x128xbf16> to vector<2x16x128xbf16>
    %51 = vector.shape_cast %50 : vector<2x16x128xbf16> to vector<32x128xbf16>
    %c2_30 = arith.constant 2 : index
    %c0_31 = arith.constant 0 : index
    %c0_32 = arith.constant 0 : index
    %52 = vector.load %arg4[%c2_30, %c0_31, %c0_32] : memref<3x128x128xbf16, #tpu.memory_space<vmem>>, vector<1x128x128xbf16>
    %53 = vector.shape_cast %52 : vector<1x128x128xbf16> to vector<128x128xbf16>
    %cst_33 = arith.constant dense<0.000000e+00> : vector<32x128xf32>
    %54 = tpu.matmul %51, %53, %cst_33 {dimension_numbers = #tpu.dot_dimension_numbers<[1], [0], [0], [1], [0, 0, 1, 1], [], []>} : vector<32x128xbf16>, vector<128x128xbf16>, vector<32x128xf32> -> vector<32x128xf32>
    %55 = arith.addf %49, %54 : vector<32x128xf32>
    %c0_34 = arith.constant 0 : index
    %c0_35 = arith.constant 0 : index
    %56 = vector.load %arg7[%c0_34, %c0_35] : memref<1x128xf32, #tpu.memory_space<vmem>>, vector<1x128xf32>
    %57 = vector.broadcast %56 : vector<1x128xf32> to vector<32x128xf32>
    %58 = arith.addf %55, %57 : vector<32x128xf32>
    %cst_36 = arith.constant 0.000000e+00 : f32
    %59 = vector.broadcast %cst_36 : f32 to vector<32x128xf32>
    %60 = arith.maximumf %58, %59 : vector<32x128xf32>
    %61 = vector.shape_cast %60 : vector<32x128xf32> to vector<2x16x128xf32>
    %cst_37 = arith.constant dense<0xFF800000> : vector<2x128xf32>
    %62 = vector.multi_reduction <maximumf>, %61, %cst_37 [1] : vector<2x16x128xf32> to vector<2x128xf32>
    %c0_38 = arith.constant 0 : index
    %c0_39 = arith.constant 0 : index
    %63 = vector.load %arg8[%c0_38, %c0_39] : memref<2x128xf32, #tpu.memory_space<vmem>>, vector<2x128xf32>
    tpu.vector_store %arg8[%c0_38, %c0_39], %62 {strides = array<i32>} : memref<2x128xf32, #tpu.memory_space<vmem>>, vector<2x128xf32>,
    return
  }
  func.func @transform_0(%arg0: i32) -> (i32, i32, i32) {
    %c0_i32 = arith.constant 0 : i32
    %c0_i32_0 = arith.constant 0 : i32
    %c0_i32_1 = arith.constant 0 : i32
    return %arg0, %c0_i32, %c0_i32_0 : i32, i32, i32
  }
  func.func @transform_1(%arg0: i32) -> (i32, i32) {
    %c0_i32 = arith.constant 0 : i32
    %c0_i32_0 = arith.constant 0 : i32
    %c0_i32_1 = arith.constant 0 : i32
    return %c0_i32, %c0_i32_0 : i32, i32
  }
  func.func @transform_2(%arg0: i32) -> (i32, i32, i32) {
    %c0_i32 = arith.constant 0 : i32
    %c0_i32_0 = arith.constant 0 : i32
    %c0_i32_1 = arith.constant 0 : i32
    %c0_i32_2 = arith.constant 0 : i32
    return %c0_i32, %c0_i32_0, %c0_i32_1 : i32, i32, i32
  }
  func.func @transform_3(%arg0: i32) -> (i32, i32, i32) {
    %c0_i32 = arith.constant 0 : i32
    %c0_i32_0 = arith.constant 0 : i32
    %c0_i32_1 = arith.constant 0 : i32
    %c0_i32_2 = arith.constant 0 : i32
    return %c0_i32, %c0_i32_0, %c0_i32_1 : i32, i32, i32
  }
  func.func @transform_4(%arg0: i32) -> (i32, i32) {
    %c0_i32 = arith.constant 0 : i32
    %c0_i32_0 = arith.constant 0 : i32
    %c0_i32_1 = arith.constant 0 : i32
    return %c0_i32, %c0_i32_0 : i32, i32
  }
  func.func @transform_5(%arg0: i32) -> (i32, i32) {
    %c0_i32 = arith.constant 0 : i32
    %c0_i32_0 = arith.constant 0 : i32
    %c0_i32_1 = arith.constant 0 : i32
    return %c0_i32, %c0_i32_0 : i32, i32
  }
  func.func @transform_6(%arg0: i32) -> (i32, i32) {
    %c0_i32 = arith.constant 0 : i32
    %c0_i32_0 = arith.constant 0 : i32
    %c0_i32_1 = arith.constant 0 : i32
    return %c0_i32, %c0_i32_0 : i32, i32
  }
  func.func @transform_7(%arg0: i32) -> (i32, i32) {
    %c0_i32 = arith.constant 0 : i32
    %c0_i32_0 = arith.constant 0 : i32
    return %arg0, %c0_i32 : i32, i32
  }
}

</mosaic_0001>

<bundles_post_ra>
// kernel: tpu_custom_call.1
= control target key start
LH: loop header
LB: loop body
LE: loop exit
PB: predicated region body
PF: predicated region fallthrough
CT: control target
= control target key end

     0   :  { %12 = vsyncpa [#allocation3], 0  ;;  %s1749_s0 = inlined_call_operand.hbm [shape: bf16[2,16,128], index: 0, kind: input, shape index: {}]   ;;  %s1750_s1 = inlined_call_operand.hbm [shape: bf16[128,128], index: 1, kind: input, shape index: {}]   ;;  %s1751_s2 = inlined_call_operand.hbm [shape: bf16[3,128,128], index: 2, kind: input, shape index: {}]   ;;  %s1752_s3 = inlined_call_operand.hbm [shape: bf16[3,128,128], index: 3, kind: input, shape index: {}]   ;;  %s1753_s4 = inlined_call_operand.vmem [shape: f32[1,128], index: 4, kind: input, shape index: {}]   ;;  %s1754_s5 = inlined_call_operand.vmem [shape: f32[1,128], index: 5, kind: input, shape index: {}]   ;;  %s1755_s6 = inlined_call_operand.vmem [shape: f32[1,128], index: 6, kind: input, shape index: {}]   ;;  %s1756_s7 = inlined_call_operand.hbm [shape: f32[2,128], index: 7, kind: output, shape index: {}]  }
   0x1   :  { %13 = vsyncpa [#allocation6], 0 }
   0x2   :  { %14 = vsyncpa [#allocation9], 0 }
   0x3   :  { %15 = vsyncpa [#allocation4], 0  ;;  %s1579_s24 = smov [#allocation5]   ;;  %s1580_s26 = smov [#allocation2]  }
   0x4   :  { %s33_s25 = sshll.u32 %s1579_s24, 4  ;;  %s21_s27 = sshll.u32 %s1580_s26, 4  ;;  %s34_s25 = int_to_ptr.vmem [resolvable:$true] %s33_s25  ;;  %s1626_s27 = int_to_ptr.vmem [resolvable:$true] %s21_s27 }
   0x5   :  { %s1461_s30 = scalar_lea.hbm %s1750_s1, 1024 }
   0x6   :  { %p1462_p0 = scmp.ne.s32.totalorder %s1750_s1, %s1461_s30  ;;  %p1465_p1 = scmp.lt.u32.totalorder %s1461_s30, %s1750_s1 }
   0x8   :  { %p1467_p2 = pnand %p1465_p1, %p1462_p0 }
   0xa   :  { %1470 = shalt.err (!%p1467_p2)
}
   0xb   :  { %s1471_s12 = scalar_lea.vmem %s34_s25, 1024  ;;  %p1476_p4 = scmp.lt.s32.totalorder %s34_s25, %s34_s25 }
   0xc   :  { %p1472_p3 = scmp.ne.s32.totalorder %s34_s25, %s1471_s12  ;;  %p1477_p5 = scmp.lt.s32.totalorder %s1471_s12, %s1471_s12 }
   0xe   :  { %p1478_p6 = por %p1477_p5, %p1476_p4 }
  0x10   :  { %p1479_p7 = pnand %p1478_p6, %p1472_p3 }
  0x12   :  { %1482 = shalt.err (!%p1479_p7)
}
  0x13   :  { %s1581_s13 = smov 64   ;;  %s1582_s14 = smov 4  }
  0x14   :  { %39 = dma.hbm_to_vmem [thread:$0]  %s1750_s1, 1024, %s34_s25, [#allocation6], %s1581_s13, %s1581_s13, %s1582_s14  }
  0x15   :  { %s1483_s19 = scalar_lea.hbm %s1749_s0, 256 }
  0x16   :  { %p1484_p8 = scmp.ne.s32.totalorder %s1749_s0, %s1483_s19  ;;  %p1487_p9 = scmp.lt.u32.totalorder %s1483_s19, %s1749_s0 }
  0x18   :  { %p1489_p10 = pnand %p1487_p9, %p1484_p8 }
  0x1a   :  { %1492 = shalt.err (!%p1489_p10)
}
  0x1b   :  { %s1493_s24 = scalar_lea.vmem %s1626_s27, 256  ;;  %p1498_p12 = scmp.lt.s32.totalorder %s1626_s27, %s1626_s27 }
  0x1c   :  { %p1494_p11 = scmp.ne.s32.totalorder %s1626_s27, %s1493_s24  ;;  %p1499_p13 = scmp.lt.s32.totalorder %s1493_s24, %s1493_s24 }
  0x1e   :  { %p1500_p0 = por %p1499_p13, %p1498_p12 }
  0x20   :  { %p1501_p1 = pnand %p1500_p0, %p1494_p11 }
  0x22   :  { %1504 = shalt.err (!%p1501_p1)
}
  0x23   :  { %27 = dma.hbm_to_vmem [thread:$0]  %s1749_s0, 256, %s1626_s27, [#allocation3], %s1581_s13, %s1581_s13, %s1582_s14  }
  0x24   :  { %s1583_s26 = smov [#allocation7]   ;;  %s1584_s29 = smov [#allocation8]  }
  0x25   :  { %s45_s28 = sshll.u32 %s1583_s26, 4  ;;  %s57_s30 = sshll.u32 %s1584_s29, 4  ;;  %s46_s28 = int_to_ptr.vmem [resolvable:$true] %s45_s28  ;;  %s1663_s30 = int_to_ptr.vmem [resolvable:$true] %s57_s30 }
  0x26   :  { %s1505_s10 = scalar_lea.hbm %s1751_s2, 3072 }
  0x27   :  { %p1506_p2 = scmp.ne.s32.totalorder %s1751_s2, %s1505_s10  ;;  %p1509_p3 = scmp.lt.u32.totalorder %s1505_s10, %s1751_s2 }
  0x29   :  { %p1511_p4 = pnand %p1509_p3, %p1506_p2 }
  0x2b   :  { %1514 = shalt.err (!%p1511_p4)
}
  0x2c   :  { %s1515_s0 = scalar_lea.vmem %s46_s28, 3072  ;;  %p1520_p6 = scmp.lt.s32.totalorder %s46_s28, %s46_s28 }
  0x2d   :  { %p1516_p5 = scmp.ne.s32.totalorder %s46_s28, %s1515_s0  ;;  %p1521_p7 = scmp.lt.s32.totalorder %s1515_s0, %s1515_s0 }
  0x2f   :  { %p1522_p8 = por %p1521_p7, %p1520_p6 }
  0x31   :  { %p1523_p9 = pnand %p1522_p8, %p1516_p5 }
  0x33   :  { %1526 = shalt.err (!%p1523_p9)
}
  0x34   :  { %51 = dma.hbm_to_vmem [thread:$0]  %s1751_s2, 3072, %s46_s28, [#allocation6], %s1581_s13, %s1581_s13, %s1582_s14  }
  0x35   :  { %s1527_s20 = scalar_lea.hbm %s1752_s3, 3072 }
  0x36   :  { %p1528_p10 = scmp.ne.s32.totalorder %s1752_s3, %s1527_s20  ;;  %p1531_p11 = scmp.lt.u32.totalorder %s1527_s20, %s1752_s3 }
  0x38   :  { %p1533_p12 = pnand %p1531_p11, %p1528_p10 }
  0x3a   :  { %1536 = shalt.err (!%p1533_p12)
}
  0x3b   :  { %s1537_s1 = scalar_lea.vmem %s1663_s30, 3072  ;;  %p1542_p0 = scmp.lt.s32.totalorder %s1663_s30, %s1663_s30 }
  0x3c   :  { %p1538_p13 = scmp.ne.s32.totalorder %s1663_s30, %s1537_s1  ;;  %p1543_p1 = scmp.lt.s32.totalorder %s1537_s1, %s1537_s1 }
  0x3e   :  { %p1544_p2 = por %p1543_p1, %p1542_p0 }
  0x40   :  { %p1545_p3 = pnand %p1544_p2, %p1538_p13 }
  0x42   :  { %1548 = shalt.err (!%p1545_p3)
}
  0x43   :  { %63 = dma.hbm_to_vmem [thread:$0]  %s1752_s3, 3072, %s1663_s30, [#allocation9], %s1581_s13, %s1581_s13, %s1582_s14  }
  0x44   :  { %1571 = dma.done.wait [#allocation3], 256  }
  0x45   :  { %1572 = vsyncadd [#allocation3], 4294967040 }
  0x46   :  { %1573 = dma.done.wait [#allocation6], 4096  }
  0x47   :  { %1574 = vsyncadd [#allocation6], 4294963200 }
  0x48   :  { %1575 = dma.done.wait [#allocation9], 3072  }
  0x49   :  { %1576 = vsyncadd [#allocation9], 4294964224  ;;  %v1403_v0 = vld [vmem:[#allocation5] sm:$0xff]   ;;  %v1404_v1 = vld [vmem:[#allocation5 + $0x8] sm:$0xff]   ;;  %vm243_vm0 = vcmask 1040384   ;;  %vm508_vm3 = vcmask 1046528  }
  0x4a   :  { %1240 = vmatprep.subr.bf16.mxu0 %v1403_v0  ;;  %v1405_v2 = vld [vmem:[#allocation5 + $0x10] sm:$0xff]   ;;  %v1406_v3 = vld [vmem:[#allocation5 + $0x18] sm:$0xff]   ;;  %v1407_v5 = vld [vmem:[#allocation5 + $0x20] sm:$0xff]   ;;  %vm244_vm1 = vsmask.f32 256  ;;  %vm1088_vm5 = vcmask 1041409  }
  0x4b   :  { %1241 = vmatpush3.bf16.msra.mxu0 %v1403_v0  ;;  %v1411_v4 = vld [vmem:[#allocation2] sm:$0xff]   ;;  %v1413_v6 = vld [vmem:[#allocation7 + $0x40] sm:$0xff]   ;;  %v1414_v7 = vld [vmem:[#allocation7 + $0x48] sm:$0xff]   ;;  %vm266_vm4 = vsmask.f32 7424 }
  0x4c   :  { %1242 = vmatprep.subr.bf16.mxu0 %v1404_v1  ;;  %1256 = vmatprep.mubr.bf16.mxu0 %v1411_v4  ;;  %v1408_v8 = vld [vmem:[#allocation5 + $0x28] sm:$0xff]   ;;  %v1409_v9 = vld [vmem:[#allocation5 + $0x30] sm:$0xff]   ;;  %v1410_v10 = vld [vmem:[#allocation5 + $0x38] sm:$0xff]  }
  0x4d   :  { %1260 = vmatprep.subr.bf16.mxu1 %v1413_v6  ;;  %v1412_v11 = vld [vmem:[#allocation2 + $0x8] sm:$0xff]   ;;  %v1415_v12 = vld [vmem:[#allocation7 + $0x50] sm:$0xff]   ;;  %v1417_v14 = vld [vmem:[#allocation7 + $0x60] sm:$0xff]  }
  0x4e   :  { %1261 = vmatpush3.bf16.msra.mxu1 %v1413_v6  ;;  %v1416_v13 = vld [vmem:[#allocation7 + $0x58] sm:$0xff]   ;;  %v1418_v15 = vld [vmem:[#allocation7 + $0x68] sm:$0xff]   ;;  %v1419_v16 = vld [vmem:[#allocation7 + $0x70] sm:$0xff]  }
  0x4f   :  { %1243 = vmatpush3.bf16.msra.mxu0 %v1404_v1  ;;  %1262 = vmatprep.subr.bf16.mxu1 %v1414_v7  ;;  %v1420_v17 = vld [vmem:[#allocation7 + $0x78] sm:$0xff]   ;;  %v1421_v18 = vld [vmem:[#allocation7] sm:$0xff]   ;;  %v1438_v20 = vld [vmem:[#allocation8 + $0x48] sm:$0xff]  }
  0x50   :  { %1244 = vmatprep.subr.bf16.mxu0 %v1405_v2  ;;  %v1437_v19 = vld [vmem:[#allocation8 + $0x40] sm:$0xff]   ;;  %v1109_v21 = vld [vmem:[%s1753_s4] ss:$0 sm:$0xff]  ;;  %vm1703_vm2 = vmand %vm243_vm0, %vm244_vm1 }
  0x51   :  { %v1422_v1 = vld [vmem:[#allocation7 + $0x8] sm:$0xff]   ;;  %v1424_v4 = vld [vmem:[#allocation7 + $0x18] sm:$0xff]  }
  0x52   :  { %1263 = vmatpush3.bf16.msra.mxu1 %v1414_v7  ;;  %v1426_v6 = vld [vmem:[#allocation7 + $0x28] sm:$0xff]   ;;  %v1427_v7 = vld [vmem:[#allocation7 + $0x30] sm:$0xff]  }
  0x53   :  { %1245 = vmatpush3.bf16.msra.mxu0 %v1405_v2  ;;  %1264 = vmatprep.subr.bf16.mxu1 %v1415_v12  ;;  %v1446_v40 = vld [vmem:[#allocation8 + $0x8] sm:$0xff]  }
  0x54   :  { %1246 = vmatprep.subr.bf16.mxu0 %v1406_v3 }
  0x56   :  { %1265 = vmatpush3.bf16.msra.mxu1 %v1415_v12  ;;  %v1430_v12 = vld [vmem:[#allocation7 + $0x88] sm:$0xff]  }
  0x57   :  { %1247 = vmatpush3.bf16.msra.mxu0 %v1406_v3  ;;  %1266 = vmatprep.subr.bf16.mxu1 %v1416_v13  ;;  %v1423_v3 = vld [vmem:[#allocation7 + $0x10] sm:$0xff]  }
  0x58   :  { %1248 = vmatprep.subr.bf16.mxu0 %v1407_v5 }
  0x5a   :  { %1267 = vmatpush3.bf16.msra.mxu1 %v1416_v13 }
  0x5b   :  { %1249 = vmatpush3.bf16.msra.mxu0 %v1407_v5  ;;  %1268 = vmatprep.subr.bf16.mxu1 %v1417_v14  ;;  %v1425_v5 = vld [vmem:[#allocation7 + $0x20] sm:$0xff]  }
  0x5c   :  { %1250 = vmatprep.subr.bf16.mxu0 %v1408_v8 }
  0x5e   :  { %1269 = vmatpush3.bf16.msra.mxu1 %v1417_v14  ;;  %v1431_v14 = vld [vmem:[#allocation7 + $0x90] sm:$0xff]  }
  0x5f   :  { %1251 = vmatpush3.bf16.msra.mxu0 %v1408_v8  ;;  %1270 = vmatprep.subr.bf16.mxu1 %v1418_v15  ;;  %v1428_v8 = vld [vmem:[#allocation7 + $0x38] sm:$0xff]  }
  0x60   :  { %1252 = vmatprep.subr.bf16.mxu0 %v1409_v9 }
  0x62   :  { %1271 = vmatpush3.bf16.msra.mxu1 %v1418_v15  ;;  %v1432_v15 = vld [vmem:[#allocation7 + $0x98] sm:$0xff]  }
  0x63   :  { %1253 = vmatpush3.bf16.msra.mxu0 %v1409_v9  ;;  %1272 = vmatprep.subr.bf16.mxu1 %v1419_v16  ;;  %v1429_v9 = vld [vmem:[#allocation7 + $0x80] sm:$0xff]  }
  0x64   :  { %1254 = vmatprep.subr.bf16.mxu0 %v1410_v10 }
  0x66   :  { %1273 = vmatpush3.bf16.msra.mxu1 %v1419_v16  ;;  %v1433_v16 = vld [vmem:[#allocation7 + $0xa0] sm:$0xff]  }
  0x67   :  { %1255 = vmatpush3.bf16.msra.mxu0 %v1410_v10  ;;  %1274 = vmatprep.subr.bf16.mxu1 %v1420_v17 }
  0x68   :  { %1320 = vmatprep.subr.bf16.mxu0 %v1437_v19 }
  0x6a   :  { %1257 = vmatmul.mubr.bf16.vlgmr.msra.gmra.mrb[0].mxu0 %v1412_v11  ;;  %1275 = vmatpush3.bf16.msra.mxu1 %v1420_v17  ;;  %v1434_v17 = vld [vmem:[#allocation7 + $0xa8] sm:$0xff]  }
  0x6b   :  { %1280 = vmatprep.subr.bf16.mxu1 %v1421_v18  ;;  %1321 = vmatpush3.bf16.msra.mxu0 %v1437_v19  ;;  %v1436_v19 = vld [vmem:[#allocation7 + $0xb8] sm:$0xff]  }
  0x6c   :  { %1322 = vmatprep.subr.bf16.mxu0 %v1438_v20 }
  0x6f   :  { %1323 = vmatpush3.bf16.msra.mxu0 %v1438_v20  ;;  %v1439_v20 = vld [vmem:[#allocation8 + $0x50] sm:$0xff]  }
  0x70   :  { %1324 = vmatprep.subr.bf16.mxu0 %v1439_v20 }
  0x73   :  { %1325 = vmatpush3.bf16.msra.mxu0 %v1439_v20  ;;  %v1456_v20 = vld [vmem:[#allocation8 + $0x98] sm:$0xff]  }
 0x13d   :  { %v1258_v22 = vpop.f32.mrb[0].mxu0 }
 0x13e   :  { %v213_v23 = vadd.f32 %v1258_v22, %v1109_v21  ;;  %v204_v24 = vpop.f32.mrb[1].mxu0  ;;  %v1441_v22 = vld [vmem:[#allocation8 + $0x60] sm:$0xff]  }
 0x13f   :  { %v205_v25 = vadd.f32 %v1109_v21, %v204_v24  ;;  %v1259_v26 = vpop.f32.mrb[2].mxu0  ;;  %v1443_v24 = vld [vmem:[#allocation8 + $0x70] sm:$0xff]  }
 0x140   :  { %v216_v27 = vadd.f32 %v1259_v26, %v1109_v21  ;;  %v207_v28 = vpop.f32.mrb[3].mxu0  ;;  %v221_v30 = vmax.f32 %v213_v23, 0.0  ;;  %v1442_v23 = vld [vmem:[#allocation8 + $0x68] sm:$0xff]   ;;  %v1445_v26 = vld [vmem:[#allocation8] sm:$0xff]  }
 0x141   :  { %v208_v29 = vadd.f32 %v1109_v21, %v207_v28  ;;  %v219_v32 = vmax.f32 %v205_v25, 0.0  ;;  %v1440_v21 = vld [vmem:[#allocation8 + $0x58] sm:$0xff]  }
 0x142   :  { %v222_v31 = vmax.f32 %v216_v27, 0.0  ;;  %1326 = vmatprep.subr.bf16.mxu0 %v1440_v21  ;;  %v1444_v25 = vld [vmem:[#allocation8 + $0x78] sm:$0xff]   ;;  %v1144_v27 = vld [vmem:[%s1754_s5] ss:$0 sm:$0xff] }
 0x143   :  { %v220_v33 = vmax.f32 %v208_v29, 0.0  ;;  %1327 = vmatpush3.bf16.msra.mxu0 %v1440_v21  ;;  %v1457_v21 = vld [vmem:[#allocation8 + $0xa0] sm:$0xff]  }
 0x144   :  { %v224_v34 = vpack.c.bf16 %v222_v31, %v221_v30  ;;  %1328 = vmatprep.subr.bf16.mxu0 %v1441_v22 }
 0x145   :  { %v223_v35 = vpack.c.bf16 %v220_v33, %v219_v32 }
 0x146   :  { %v233_v36 = vshrl.u32 %v224_v34, 16  ;;  %v236_v39 = vshll.u32 %v224_v34, 16 }
 0x147   :  { %v226_v37 = vshrl.u32 %v223_v35, 16  ;;  %v229_v42 = vshll.u32 %v223_v35, 16  ;;  %1329 = vmatpush3.bf16.msra.mxu0 %v1441_v22  ;;  %v1458_v22 = vld [vmem:[#allocation8 + $0xa8] sm:$0xff]  }
 0x148   :  { %v235_v38 = vrot.slane %v233_v36, 7  ;;  %1330 = vmatprep.subr.bf16.mxu0 %v1442_v23 }
 0x149   :  { %v228_v41 = vrot.slane %v226_v37, 7 }
 0x14a   :  { %v238_v43 = vor.u32 %v236_v39, %v235_v38  ;;  %v249_v44 = vsel %vm1703_vm2, %v235_v38, 0 }
 0x14b   :  { %v231_v45 = vor.u32 %v229_v42, %v228_v41  ;;  %v248_v46 = vsel %vm1703_vm2, %v228_v41, 0  ;;  %v287_v52 = vshll.u32 %v249_v44, 16  ;;  %v513_v56 = vrot.slane %v249_v44, 1  ;;  %1331 = vmatpush3.bf16.msra.mxu0 %v1442_v23  ;;  %v1459_v23 = vld [vmem:[#allocation8 + $0xb0] sm:$0xff]  }
 0x14c   :  { %v247_v47 = vsel %vm1703_vm2, 0, %v238_v43  ;;  %v275_v51 = vshll.u32 %v248_v46, 16  ;;  %v510_v11 = vrot.slane %v248_v46, 1  ;;  %1332 = vmatprep.subr.bf16.mxu0 %v1443_v24 }
 0x14d   :  { %v246_v48 = vsel %vm1703_vm2, 0, %v231_v45  ;;  %v282_v49 = vshll.u32 %v247_v47, 16  ;;  %v280_v53 = vshrl.u32 %v247_v47, 16  ;;  %v512_v55 = vrot.slane %v247_v47, 1 }
 0x14e   :  { %v270_v50 = vshll.u32 %v246_v48, 16  ;;  %v268_v57 = vshrl.u32 %v246_v48, 16  ;;  %v277_v62 = vrot.slane %v275_v51, 1  ;;  %v289_v63 = vrot.slane %v287_v52, 1 }
 0x14f   :  { %v284_v54 = vrot.slane %v282_v49, 1  ;;  %v514_v60 = vsel %vm508_vm3, %v512_v55, %v513_v56  ;;  %v509_v10 = vrot.slane %v246_v48, 1  ;;  %1333 = vmatpush3.bf16.msra.mxu0 %v1443_v24  ;;  %v1460_v24 = vld [vmem:[#allocation8 + $0xb8] sm:$0xff]  }
 0x150   :  { %v272_v58 = vrot.slane %v270_v50, 1  ;;  %1334 = vmatprep.subr.bf16.mxu0 %v1444_v25 }
 0x151   :  { %v285_v59 = vor.u32 %v284_v54, %v280_v53  ;;  %v511_v13 = vsel %vm508_vm3, %v509_v10, %v510_v11  ;;  %v1449_v10 = vld [vmem:[#allocation8 + $0x20] sm:$0xff]   ;;  %v1450_v11 = vld [vmem:[#allocation8 + $0x28] sm:$0xff]  }
 0x152   :  { %v273_v61 = vor.u32 %v272_v58, %v268_v57 }
 0x153   :  { %v290_v2 = vsel %vm266_vm4, %v285_v59, %v289_v63  ;;  %1335 = vmatpush3.bf16.msra.mxu0 %v1444_v25  ;;  %v1169_v25 = vld [vmem:[%s1755_s6] ss:$0 sm:$0xff]  ;;  %s1585_s6 = smov [#allocation10]  }
 0x154   :  { %v278_v0 = vsel %vm266_vm4, %v273_v61, %v277_v62  ;;  %1340 = vmatprep.subr.bf16.mxu0 %v1445_v26  ;;  %s1098_s28 = sshll.u32 %s1585_s6, 4  ;;  %s1099_s28 = int_to_ptr.vmem [resolvable:$true] %s1098_s28 }
 0x155   :  { %1276 = vmatprep.mubr.bf16.mxu1 %v278_v0  ;;  %s1549_s29 = scalar_lea.vmem %s1099_s28, 32  ;;  %p1554_p5 = scmp.lt.s32.totalorder %s1099_s28, %s1099_s28 }
 0x156   :  { %1277 = vmatmul.mubr.bf16.vlgmr.msra.gmra.mrb[0].mxu1 %v290_v2  ;;  %p1550_p4 = scmp.ne.s32.totalorder %s1099_s28, %s1549_s29  ;;  %p1555_p6 = scmp.lt.s32.totalorder %s1549_s29, %s1549_s29 }
 0x157   :  { %1281 = vmatpush3.bf16.msra.mxu1 %v1421_v18  ;;  %1296 = vmatprep.mubr.bf16.mxu1 %v246_v48  ;;  %v1435_v18 = vld [vmem:[#allocation7 + $0xb0] sm:$0xff]  }
 0x158   :  { %1282 = vmatprep.subr.bf16.mxu1 %v1422_v1  ;;  %p1556_p7 = por %p1555_p6, %p1554_p5 }
 0x15a   :  { %p1557_p8 = pnand %p1556_p7, %p1550_p4 }
 0x15b   :  { %1283 = vmatpush3.bf16.msra.mxu1 %v1422_v1 }
 0x15c   :  { %1284 = vmatprep.subr.bf16.mxu1 %v1423_v3 }
 0x15f   :  { %1285 = vmatpush3.bf16.msra.mxu1 %v1423_v3 }
 0x160   :  { %1286 = vmatprep.subr.bf16.mxu1 %v1424_v4 }
 0x163   :  { %1287 = vmatpush3.bf16.msra.mxu1 %v1424_v4 }
 0x164   :  { %1288 = vmatprep.subr.bf16.mxu1 %v1425_v5 }
 0x167   :  { %1289 = vmatpush3.bf16.msra.mxu1 %v1425_v5 }
 0x168   :  { %1290 = vmatprep.subr.bf16.mxu1 %v1426_v6 }
 0x16b   :  { %1291 = vmatpush3.bf16.msra.mxu1 %v1426_v6 }
 0x16c   :  { %1292 = vmatprep.subr.bf16.mxu1 %v1427_v7 }
 0x16f   :  { %1293 = vmatpush3.bf16.msra.mxu1 %v1427_v7 }
 0x170   :  { %1294 = vmatprep.subr.bf16.mxu1 %v1428_v8 }
 0x173   :  { %1295 = vmatpush3.bf16.msra.mxu1 %v1428_v8  ;;  %v1447_v8 = vld [vmem:[#allocation8 + $0x10] sm:$0xff]  }
 0x174   :  { %1300 = vmatprep.subr.bf16.mxu1 %v1429_v9 }
 0x176   :  { %1297 = vmatmul.mubr.bf16.vlgmr.msra.gmra.mrb[0].mxu1 %v247_v47 }
 0x177   :  { %1301 = vmatpush3.bf16.msra.mxu1 %v1429_v9  ;;  %1316 = vmatprep.mubr.bf16.mxu1 %v511_v13  ;;  %v1448_v9 = vld [vmem:[#allocation8 + $0x18] sm:$0xff]  }
 0x178   :  { %1302 = vmatprep.subr.bf16.mxu1 %v1430_v12  ;;  %v1452_v13 = vld [vmem:[#allocation8 + $0x38] sm:$0xff]  }
 0x17b   :  { %1303 = vmatpush3.bf16.msra.mxu1 %v1430_v12  ;;  %v1451_v12 = vld [vmem:[#allocation8 + $0x30] sm:$0xff]  }
 0x17c   :  { %1304 = vmatprep.subr.bf16.mxu1 %v1431_v14 }
 0x17f   :  { %1305 = vmatpush3.bf16.msra.mxu1 %v1431_v14  ;;  %v1453_v14 = vld [vmem:[#allocation8 + $0x80] sm:$0xff]  }
 0x180   :  { %1306 = vmatprep.subr.bf16.mxu1 %v1432_v15 }
 0x183   :  { %1307 = vmatpush3.bf16.msra.mxu1 %v1432_v15 }
 0x184   :  { %1308 = vmatprep.subr.bf16.mxu1 %v1433_v16 }
 0x187   :  { %1309 = vmatpush3.bf16.msra.mxu1 %v1433_v16 }
 0x188   :  { %1310 = vmatprep.subr.bf16.mxu1 %v1434_v17 }
 0x18b   :  { %1311 = vmatpush3.bf16.msra.mxu1 %v1434_v17  ;;  %v1454_v17 = vld [vmem:[#allocation8 + $0x88] sm:$0xff]  }
 0x18c   :  { %1312 = vmatprep.subr.bf16.mxu1 %v1435_v18 }
 0x18f   :  { %1313 = vmatpush3.bf16.msra.mxu1 %v1435_v18 }
 0x190   :  { %1314 = vmatprep.subr.bf16.mxu1 %v1436_v19 }
 0x193   :  { %1315 = vmatpush3.bf16.msra.mxu1 %v1436_v19  ;;  %v1455_v19 = vld [vmem:[#allocation8 + $0x90] sm:$0xff]  }
 0x196   :  { %1317 = vmatmul.mubr.bf16.vlgmr.msra.gmra.mrb[0].mxu1 %v514_v60 }
 0x269   :  { %v1318_v28 = vpop.f32.mrb[0].mxu1 }
 0x26a   :  { %v644_v29 = vadd.f32 %v1318_v28, %v1144_v27  ;;  %v616_v30 = vpop.f32.mrb[1].mxu1 }
 0x26b   :  { %v642_v31 = vadd.f32 %v1144_v27, %v616_v30  ;;  %v1319_v32 = vpop.f32.mrb[2].mxu1 }
 0x26c   :  { %v645_v33 = vadd.f32 %v1319_v32, %v1144_v27  ;;  %v619_v34 = vpop.f32.mrb[3].mxu1  ;;  %v648_v36 = vmax.f32 %v644_v29, 0.0 }
 0x26d   :  { %v643_v35 = vadd.f32 %v1144_v27, %v619_v34  ;;  %v646_v38 = vmax.f32 %v642_v31, 0.0 }
 0x26e   :  { %v649_v37 = vmax.f32 %v645_v33, 0.0 }
 0x26f   :  { %v647_v39 = vmax.f32 %v643_v35, 0.0 }
 0x270   :  { %v651_v41 = vpack.c.bf16 %v649_v37, %v648_v36 }
 0x271   :  { %v650_v42 = vpack.c.bf16 %v647_v39, %v646_v38 }
 0x272   :  { %v660_v43 = vshrl.u32 %v651_v41, 16  ;;  %v663_v46 = vshll.u32 %v651_v41, 16 }
 0x273   :  { %v653_v44 = vshrl.u32 %v650_v42, 16  ;;  %v656_v48 = vshll.u32 %v650_v42, 16 }
 0x274   :  { %v662_v45 = vrot.slane %v660_v43, 7 }
 0x275   :  { %v655_v47 = vrot.slane %v653_v44, 7 }
 0x276   :  { %v665_v49 = vor.u32 %v663_v46, %v662_v45  ;;  %v673_v50 = vsel %vm1703_vm2, %v662_v45, 0 }
 0x277   :  { %v658_v51 = vor.u32 %v656_v48, %v655_v47  ;;  %v672_v52 = vsel %vm1703_vm2, %v655_v47, 0  ;;  %v710_v58 = vshll.u32 %v673_v50, 16  ;;  %v935_v62 = vrot.slane %v673_v50, 1 }
 0x278   :  { %v671_v53 = vsel %vm1703_vm2, 0, %v665_v49  ;;  %v698_v57 = vshll.u32 %v672_v52, 16  ;;  %v932_v16 = vrot.slane %v672_v52, 1 }
 0x279   :  { %v670_v54 = vsel %vm1703_vm2, 0, %v658_v51  ;;  %v705_v55 = vshll.u32 %v671_v53, 16  ;;  %v703_v59 = vshrl.u32 %v671_v53, 16  ;;  %v934_v61 = vrot.slane %v671_v53, 1 }
 0x27a   :  { %v693_v56 = vshll.u32 %v670_v54, 16  ;;  %v691_v63 = vshrl.u32 %v670_v54, 16  ;;  %v700_v4 = vrot.slane %v698_v57, 1  ;;  %v712_v5 = vrot.slane %v710_v58, 1 }
 0x27b   :  { %v707_v60 = vrot.slane %v705_v55, 1  ;;  %v936_v2 = vsel %vm508_vm3, %v934_v61, %v935_v62  ;;  %v931_v15 = vrot.slane %v670_v54, 1 }
 0x27c   :  { %v695_v0 = vrot.slane %v693_v56, 1 }
 0x27d   :  { %v708_v1 = vor.u32 %v707_v60, %v703_v59  ;;  %v933_v18 = vsel %vm508_vm3, %v931_v15, %v932_v16 }
 0x27e   :  { %v696_v3 = vor.u32 %v695_v0, %v691_v63 }
 0x27f   :  { %v713_v7 = vsel %vm266_vm4, %v708_v1, %v712_v5 }
 0x280   :  { %v701_v6 = vsel %vm266_vm4, %v696_v3, %v700_v4 }
 0x281   :  { %1336 = vmatprep.mubr.bf16.mxu0 %v701_v6 }
 0x282   :  { %1337 = vmatmul.mubr.bf16.vlgmr.msra.gmra.mrb[4].mxu0 %v713_v7 }
 0x283   :  { %1341 = vmatpush3.bf16.msra.mxu0 %v1445_v26  ;;  %1356 = vmatprep.mubr.bf16.mxu0 %v670_v54 }
 0x284   :  { %1342 = vmatprep.subr.bf16.mxu0 %v1446_v40 }
 0x287   :  { %1343 = vmatpush3.bf16.msra.mxu0 %v1446_v40 }
 0x288   :  { %1344 = vmatprep.subr.bf16.mxu0 %v1447_v8 }
 0x28b   :  { %1345 = vmatpush3.bf16.msra.mxu0 %v1447_v8 }
 0x28c   :  { %1346 = vmatprep.subr.bf16.mxu0 %v1448_v9 }
 0x28f   :  { %1347 = vmatpush3.bf16.msra.mxu0 %v1448_v9 }
 0x290   :  { %1348 = vmatprep.subr.bf16.mxu0 %v1449_v10 }
 0x293   :  { %1349 = vmatpush3.bf16.msra.mxu0 %v1449_v10 }
 0x294   :  { %1350 = vmatprep.subr.bf16.mxu0 %v1450_v11 }
 0x297   :  { %1351 = vmatpush3.bf16.msra.mxu0 %v1450_v11 }
 0x298   :  { %1352 = vmatprep.subr.bf16.mxu0 %v1451_v12 }
 0x29b   :  { %1353 = vmatpush3.bf16.msra.mxu0 %v1451_v12 }
 0x29c   :  { %1354 = vmatprep.subr.bf16.mxu0 %v1452_v13 }
 0x29f   :  { %1355 = vmatpush3.bf16.msra.mxu0 %v1452_v13 }
 0x2a0   :  { %1360 = vmatprep.subr.bf16.mxu0 %v1453_v14 }
 0x2a2   :  { %1357 = vmatmul.mubr.bf16.vlgmr.msra.gmra.mrb[4].mxu0 %v671_v53 }
 0x2a3   :  { %1361 = vmatpush3.bf16.msra.mxu0 %v1453_v14  ;;  %1376 = vmatprep.mubr.bf16.mxu0 %v933_v18 }
 0x2a4   :  { %1362 = vmatprep.subr.bf16.mxu0 %v1454_v17 }
 0x2a7   :  { %1363 = vmatpush3.bf16.msra.mxu0 %v1454_v17 }
 0x2a8   :  { %1364 = vmatprep.subr.bf16.mxu0 %v1455_v19 }
 0x2ab   :  { %1365 = vmatpush3.bf16.msra.mxu0 %v1455_v19 }
 0x2ac   :  { %1366 = vmatprep.subr.bf16.mxu0 %v1456_v20 }
 0x2af   :  { %1367 = vmatpush3.bf16.msra.mxu0 %v1456_v20 }
 0x2b0   :  { %1368 = vmatprep.subr.bf16.mxu0 %v1457_v21 }
 0x2b3   :  { %1369 = vmatpush3.bf16.msra.mxu0 %v1457_v21 }
 0x2b4   :  { %1370 = vmatprep.subr.bf16.mxu0 %v1458_v22 }
 0x2b7   :  { %1371 = vmatpush3.bf16.msra.mxu0 %v1458_v22 }
 0x2b8   :  { %1372 = vmatprep.subr.bf16.mxu0 %v1459_v23 }
 0x2bb   :  { %1373 = vmatpush3.bf16.msra.mxu0 %v1459_v23 }
 0x2bc   :  { %1374 = vmatprep.subr.bf16.mxu0 %v1460_v24 }
 0x2bf   :  { %1375 = vmatpush3.bf16.msra.mxu0 %v1460_v24 }
 0x2c2   :  { %1377 = vmatmul.mubr.bf16.vlgmr.msra.gmra.mrb[4].mxu0 %v936_v2 }
 0x395   :  { %v1378_v26 = vpop.f32.mrb[4].mxu0 }
 0x396   :  { %v1066_v27 = vadd.f32 %v1378_v26, %v1169_v25  ;;  %v1038_v28 = vpop.f32.mrb[5].mxu0 }
 0x397   :  { %v1064_v29 = vadd.f32 %v1169_v25, %v1038_v28  ;;  %v1379_v30 = vpop.f32.mrb[6].mxu0 }
 0x398   :  { %v1067_v31 = vadd.f32 %v1379_v30, %v1169_v25  ;;  %v1041_v32 = vpop.f32.mrb[7].mxu0  ;;  %v1070_v34 = vmax.f32 %v1066_v27, 0.0 }
 0x399   :  { %v1065_v33 = vadd.f32 %v1169_v25, %v1041_v32  ;;  %v1068_v36 = vmax.f32 %v1064_v29, 0.0 }
 0x39a   :  { %v1071_v35 = vmax.f32 %v1067_v31, 0.0 }
 0x39b   :  { %v1069_v37 = vmax.f32 %v1065_v33, 0.0 }
 0x39c   :  { %v1079_v38 = vmax.f32 %v1070_v34, %v1071_v35 }
 0x39d   :  { %v1072_v39 = vmax.f32 %v1068_v36, %v1069_v37 }
 0x39e   :  { %v1080_v41 = vrot.slane %v1079_v38, 4 }
 0x39f   :  { %v1073_v42 = vrot.slane %v1072_v39, 4 }
 0x3a0   :  { %v1081_v43 = vmax.f32 %v1079_v38, %v1080_v41 }
 0x3a1   :  { %v1074_v44 = vmax.f32 %v1072_v39, %v1073_v42 }
 0x3a2   :  { %v1082_v45 = vrot.slane %v1081_v43, 2 }
 0x3a3   :  { %v1075_v46 = vrot.slane %v1074_v44, 2 }
 0x3a4   :  { %v1083_v47 = vmax.f32 %v1081_v43, %v1082_v45 }
 0x3a5   :  { %v1076_v48 = vmax.f32 %v1074_v44, %v1075_v46 }
 0x3a6   :  { %v1084_v49 = vrot.slane %v1083_v47, 1 }
 0x3a7   :  { %v1077_v50 = vrot.slane %v1076_v48, 1 }
 0x3a8   :  { %v1085_v51 = vmax.f32 %v1083_v47, %v1084_v49 }
 0x3a9   :  { %v1078_v52 = vmax.f32 %v1076_v48, %v1077_v50 }
 0x3ab   :  { %v1089_v53 = vsel %vm1088_vm5, %v1085_v51, %v1078_v52 }
 0x3ac   :  { %1091 = vst [vmem:[#allocation10] sm:$0x3] %v1089_v53 }
 0x3ad   :  { %1560 = shalt.err (!%p1557_p8)
}
 0x3ae   :  { %s1561_s9 = scalar_lea.hbm %s1756_s7, 32 }
 0x3af   :  { %p1562_p9 = scmp.ne.s32.totalorder %s1756_s7, %s1561_s9  ;;  %p1565_p10 = scmp.lt.u32.totalorder %s1561_s9, %s1756_s7 }
 0x3b1   :  { %p1567_p11 = pnand %p1565_p10, %p1562_p9 }
 0x3b3   :  { %1570 = shalt.err (!%p1567_p11)
}
 0x3b4   :  { %1101 = dma.vmem_to_hbm [thread:$0]  %s1099_s28, 32, %s1756_s7, [#allocation4]  }
 0x3b5   :  { %1577 = dma.done.wait [#allocation4], 32  }
 0x3b6   :  { %1578 = vsyncadd [#allocation4], 4294967264 }
 0x3b7   :  { %1105 = vsyncpa [#allocation3], 1 }
 0x3b8   :  { %1106 = vsyncpa [#allocation6], 1 }
 0x3b9   :  { %1107 = vsyncpa [#allocation9], 1 }
 0x3ba   :  { %1108 = vsyncpa [#allocation4], 1 }

</bundles_post_ra>
